<compile_context>
chip_gen: v6e
topology: v6e:2x2x1
jax: 0.10.0
libtpu: 0.0.40
codegen_flags: <defaults>
</compile_context>

<pallas_src>
import functools

import numpy as np
import jax
import jax.numpy as jnp
from jax.experimental import pallas as pl
from jax.experimental.pallas import tpu as pltpu


def _moving_avg_mxu_kernel(x_ref, w_ref, o_ref, *, inv_k, split_f32):
    """One block: (bt, L*C) @ (L*C, L_out*C) banded weight on the MXU.

    The weight already encodes replicate padding (duplicated band rows) and the
    stride (only strided output columns are present), so the body is a single
    matmul + f32 scale: no block-sized concatenate/upcast temporaries and no
    lane-unaligned tap slices.
    """
    w = w_ref[...]  # bf16; small-integer tap counts (exactly representable)
    if split_f32:
        # Split f32 activations into three bf16 terms so the matmul runs on the
        # bf16 MXU on every generation (v5e has no f32 MXU mode) while keeping
        # ~f32 accuracy (representation error ~2^-24 per element).
        x = x_ref[...].astype(jnp.float32)
        hi = x.astype(jnp.bfloat16)
        r1 = x - hi.astype(jnp.float32)
        mid = r1.astype(jnp.bfloat16)
        lo = (r1 - mid.astype(jnp.float32)).astype(jnp.bfloat16)
        acc = jnp.dot(hi, w, preferred_element_type=jnp.float32)
        acc = acc + jnp.dot(mid, w, preferred_element_type=jnp.float32)
        acc = acc + jnp.dot(lo, w, preferred_element_type=jnp.float32)
    else:
        acc = jnp.dot(x_ref[...], w, preferred_element_type=jnp.float32)
    o_ref[...] = (acc * inv_k).astype(o_ref.dtype)


def _band_weight(L, C, K, pad, stride, l_out):
    """(L*C, L_out*C) block-banded weight.

    W[s*C + c, t*C + c] = number of taps of output step t that read input step s
    after replicate padding and clipping. Entries are small integers (exact in
    bf16); the 1/K normalization is applied in f32 inside the kernel.
    """
    counts = np.zeros((L, l_out), np.float32)
    t = np.arange(l_out)[:, None]                      # (l_out, 1)
    k = np.arange(K)[None, :]                          # (1, K)
    src = np.clip(t * stride + k - pad, 0, L - 1)      # (l_out, K) source step per tap
    np.add.at(counts, (src.reshape(-1), np.repeat(np.arange(l_out), K)), 1.0)
    w = np.einsum('st,cd->sctd', counts, np.eye(C, dtype=np.float32))
    return jnp.asarray(w.reshape(L * C, l_out * C), dtype=jnp.bfloat16)


_MAX_BLOCK_BYTES = 2 << 20    # ~2 MiB input block ceiling (>=85% of HBM roofline per tile sweeps)
_MIN_BLOCK_BYTES = 512 << 10  # ~512 KiB floor: don't shrink blocks below this chasing step count
_MIN_GRID_STEPS = 8           # >=8 grid steps => >=4 per v7x TensorCore, real DMA/compute overlap


def _pick_batch_tile(B, row_bytes):
    if B <= 8:
        return B                                            # tiny batch: one full block
    hi = max(8, _MAX_BLOCK_BYTES // max(row_bytes, 1))      # block-byte ceiling
    lo = max(8, _MIN_BLOCK_BYTES // max(row_bytes, 1))      # block-byte floor
    by_steps = max(1, B // _MIN_GRID_STEPS)                 # bt <= this => >= _MIN_GRID_STEPS steps
    bt = min(hi, max(lo, by_steps))                         # prefer >=512 KiB blocks over extra steps
    bt = max(8, (bt // 8) * 8)                              # sublane-friendly multiple of 8
    return int(min(bt, B))


def moving_avg(x, kernel_size: int, stride: int):
    """x: (B, L, C) -> (B, L_out, C), matching MovingAvg.forward."""
    B, L, C = x.shape
    K = int(kernel_size)
    stride = int(stride)
    assert K >= 1 and stride >= 1
    pad = (K - 1) // 2
    l_pad = L + 2 * pad
    l_out = (l_pad - K) // stride + 1
    assert l_out >= 1, "kernel_size too large for input length"

    lc, loc = L * C, l_out * C
    # Row-major reshape is a free view for default layouts (a non-default layout
    # would force XLA to copy here; keep inputs in their natural (B, L, C) order).
    x_flat = x.reshape(B, lc)

    # Weight encodes replicate padding AND stride -> no wrapper-side pad pass and
    # no strided output re-read. Built once on host (exact integer counts).
    w = _band_weight(L, C, K, pad, stride, l_out)

    in_itemsize = jnp.dtype(x.dtype).itemsize
    bt = _pick_batch_tile(B, lc * in_itemsize)
    grid = (pl.cdiv(B, bt),)
    split_f32 = jnp.dtype(x.dtype) != jnp.dtype(jnp.bfloat16)

    # Explicit VMEM accounting: double-buffered in/out blocks + resident weight
    # (conservatively x2) + kernel temporaries (f32 view, bf16 split terms, f32
    # accumulator) + slack. Floored at 16 MiB (safe on every generation).
    in_blk = bt * lc * in_itemsize
    out_blk = bt * loc * in_itemsize
    w_bytes = int(w.size) * w.dtype.itemsize
    temp_bytes = bt * lc * (16 if split_f32 else 4) + bt * loc * 4
    vmem_budget = 2 * (in_blk + out_blk) + 2 * w_bytes + temp_bytes + (4 << 20)
    vmem_budget = int(max(vmem_budget, 16 << 20))

    kernel = functools.partial(_moving_avg_mxu_kernel, inv_k=1.0 / K, split_f32=split_f32)
    out_flat = pl.pallas_call(
        kernel,
        out_shape=jax.ShapeDtypeStruct((B, loc), x.dtype),
        grid=grid,
        in_specs=[
            pl.BlockSpec((bt, lc), lambda b: (b, 0)),
            pl.BlockSpec((lc, loc), lambda b: (0, 0)),  # constant block index: DMA'd once
        ],
        out_specs=pl.BlockSpec((bt, loc), lambda b: (b, 0)),
        compiler_params=pltpu.CompilerParams(
            dimension_semantics=("parallel",),
            vmem_limit_bytes=vmem_budget,
        ),
    )(x_flat, w)
    return out_flat.reshape(B, l_out, C)


def _reference_moving_avg(x, kernel_size: int, stride: int):
    # Pure-JAX reference reproducing the PyTorch forward exactly.
    pad = (kernel_size - 1) // 2
    front = jnp.repeat(x[:, :1, :], pad, axis=1)
    end = jnp.repeat(x[:, -1:, :], pad, axis=1)
    xpad = jnp.concatenate([front, x, end], axis=1)  # (B, L_pad, C)
    l_pad = xpad.shape[1]
    l_out = (l_pad - kernel_size) // stride + 1
    windows = jnp.stack(
        [xpad[:, t * stride:t * stride + kernel_size, :] for t in range(l_out)],
        axis=1,
    )  # (B, L_out, K, C)
    return windows.mean(axis=2)


if __name__ == "__main__":
    key = jax.random.PRNGKey(0)
    B, L, C = 2, 16, 8
    x = jax.random.normal(key, (B, L, C), dtype=jnp.float32)

    # Primary config: MovingAvg(kernel_size=5, stride=1), f32 (split-bf16 MXU path).
    out = jax.block_until_ready(moving_avg(x, 5, 1))
    ref = _reference_moving_avg(x, 5, 1)
    assert out.shape == ref.shape, (out.shape, ref.shape)
    assert jnp.allclose(out, ref, atol=1e-5, rtol=1e-5)

    # Secondary config: even kernel, stride > 1 (stride folded into the band weight).
    out2 = jax.block_until_ready(moving_avg(x, 4, 2))
    ref2 = _reference_moving_avg(x, 4, 2)
    assert out2.shape == ref2.shape, (out2.shape, ref2.shape)
    assert jnp.allclose(out2, ref2, atol=1e-5, rtol=1e-5)

    # bf16 input exercises the single-pass MXU path (looser tolerance: bf16 output).
    xb = x.astype(jnp.bfloat16)
    out3 = jax.block_until_ready(moving_avg(xb, 5, 1))
    ref3 = _reference_moving_avg(xb.astype(jnp.float32), 5, 1)
    assert out3.shape == ref3.shape, (out3.shape, ref3.shape)
    assert jnp.allclose(out3.astype(jnp.float32), ref3, atol=1e-2, rtol=2e-2)

    print("KERNEL_OK")
</pallas_src>

<mosaic_0001>
module attributes {stable_mosaic.version = 11 : i64} {
  func.func @_moving_avg_mxu_kernel(%arg0: i32, %arg1: memref<2x128xf32, #tpu.memory_space<vmem>>, %arg2: memref<128x128xbf16, #tpu.memory_space<vmem>>, %arg3: memref<2x128xf32, #tpu.memory_space<vmem>>) attributes {dimension_semantics = [#tpu.dimension_semantics<parallel>], iteration_bounds = array<i64: 1>, scalar_prefetch = 0 : i64, scratch_operands = 0 : i64, tpu.core_type = #tpu.core_type<tc>, window_params = [{transform_indices = @transform_0, window_bounds = array<i64: 2, 128>}, {pipeline_mode = #tpu.pipeline_mode<synchronous>, transform_indices = @transform_1, window_bounds = array<i64: 128, 128>}, {transform_indices = @transform_2, window_bounds = array<i64: 2, 128>}]} {
    %c0 = arith.constant 0 : index
    %c0_0 = arith.constant 0 : index
    %0 = vector.load %arg2[%c0, %c0_0] : memref<128x128xbf16, #tpu.memory_space<vmem>>, vector<128x128xbf16>
    %c0_1 = arith.constant 0 : index
    %c0_2 = arith.constant 0 : index
    %1 = vector.load %arg1[%c0_1, %c0_2] : memref<2x128xf32, #tpu.memory_space<vmem>>, vector<2x128xf32>
    %2 = arith.truncf %1 : vector<2x128xf32> to vector<2x128xbf16>
    %3 = arith.extf %2 : vector<2x128xbf16> to vector<2x128xf32>
    %4 = arith.subf %1, %3 : vector<2x128xf32>
    %5 = arith.truncf %4 : vector<2x128xf32> to vector<2x128xbf16>
    %6 = arith.extf %5 : vector<2x128xbf16> to vector<2x128xf32>
    %7 = arith.subf %4, %6 : vector<2x128xf32>
    %8 = arith.truncf %7 : vector<2x128xf32> to vector<2x128xbf16>
    %cst = arith.constant dense<0.000000e+00> : vector<2x128xf32>
    %9 = tpu.matmul %2, %0, %cst {dimension_numbers = #tpu.dot_dimension_numbers<[1], [0], [0], [1], [0, 0, 1, 1], [], []>} : vector<2x128xbf16>, vector<128x128xbf16>, vector<2x128xf32> -> vector<2x128xf32>
    %cst_3 = arith.constant dense<0.000000e+00> : vector<2x128xf32>
    %10 = tpu.matmul %5, %0, %cst_3 {dimension_numbers = #tpu.dot_dimension_numbers<[1], [0], [0], [1], [0, 0, 1, 1], [], []>} : vector<2x128xbf16>, vector<128x128xbf16>, vector<2x128xf32> -> vector<2x128xf32>
    %11 = arith.addf %9, %10 : vector<2x128xf32>
    %cst_4 = arith.constant dense<0.000000e+00> : vector<2x128xf32>
    %12 = tpu.matmul %8, %0, %cst_4 {dimension_numbers = #tpu.dot_dimension_numbers<[1], [0], [0], [1], [0, 0, 1, 1], [], []>} : vector<2x128xbf16>, vector<128x128xbf16>, vector<2x128xf32> -> vector<2x128xf32>
    %13 = arith.addf %11, %12 : vector<2x128xf32>
    %cst_5 = arith.constant 2.000000e-01 : f32
    %14 = vector.broadcast %cst_5 : f32 to vector<2x128xf32>
    %15 = arith.mulf %13, %14 : vector<2x128xf32>
    %c0_6 = arith.constant 0 : index
    %c0_7 = arith.constant 0 : index
    %16 = vector.load %arg3[%c0_6, %c0_7] : memref<2x128xf32, #tpu.memory_space<vmem>>, vector<2x128xf32>
    tpu.vector_store %arg3[%c0_6, %c0_7], %15 {strides = array<i32>} : memref<2x128xf32, #tpu.memory_space<vmem>>, vector<2x128xf32>,
    return
  }
  func.func @transform_0(%arg0: i32) -> (i32, i32) {
    %c0_i32 = arith.constant 0 : i32
    %c0_i32_0 = arith.constant 0 : i32
    return %arg0, %c0_i32 : i32, i32
  }
  func.func @transform_1(%arg0: i32) -> (i32, i32) {
    %c0_i32 = arith.constant 0 : i32
    %c0_i32_0 = arith.constant 0 : i32
    %c0_i32_1 = arith.constant 0 : i32
    return %c0_i32, %c0_i32_0 : i32, i32
  }
  func.func @transform_2(%arg0: i32) -> (i32, i32) {
    %c0_i32 = arith.constant 0 : i32
    %c0_i32_0 = arith.constant 0 : i32
    return %arg0, %c0_i32 : i32, i32
  }
}

</mosaic_0001>

<bundles_post_ra>
// kernel: tpu_custom_call.1
= control target key start
LH: loop header
LB: loop body
LE: loop exit
PB: predicated region body
PF: predicated region fallthrough
CT: control target
= control target key end

     0   :  { %7 = vsyncpa [#allocation3], 0  ;;  %s487_s0 = inlined_call_operand.hbm [shape: f32[2,128], index: 0, kind: input, shape index: {}]   ;;  %s488_s1 = inlined_call_operand.hbm [shape: bf16[128,128], index: 1, kind: input, shape index: {}]   ;;  %s489_s2 = inlined_call_operand.hbm [shape: f32[2,128], index: 2, kind: output, shape index: {}]  }
   0x1   :  { %8 = vsyncpa [#allocation6], 0 }
   0x2   :  { %9 = vsyncpa [#allocation4], 0  ;;  %s426_s9 = smov [#allocation2]   ;;  %s427_s11 = smov [#allocation5]  }
   0x3   :  { %s16_s10 = sshll.u32 %s426_s9, 4  ;;  %s25_s12 = sshll.u32 %s427_s11, 4  ;;  %s17_s10 = int_to_ptr.vmem [resolvable:$true] %s16_s10  ;;  %s26_s12 = int_to_ptr.vmem [resolvable:$true] %s25_s12 }
   0x4   :  { %s368_s13 = scalar_lea.vmem %s17_s10, 32  ;;  %p373_p1 = scmp.lt.s32.totalorder %s17_s10, %s17_s10 }
   0x5   :  { %p369_p0 = scmp.ne.s32.totalorder %s17_s10, %s368_s13  ;;  %p374_p2 = scmp.lt.s32.totalorder %s368_s13, %s368_s13 }
   0x7   :  { %p375_p3 = por %p374_p2, %p373_p1 }
   0x9   :  { %p376_p4 = pnand %p375_p3, %p369_p0 }
   0xb   :  { %379 = shalt.err (!%p376_p4)
}
   0xc   :  { %19 = dma.hbm_to_vmem [thread:$0]  %s487_s0, 32, %s17_s10, [#allocation3]  }
   0xd   :  { %s388_s16 = scalar_lea.vmem %s26_s12, 1024  ;;  %p393_p6 = scmp.lt.s32.totalorder %s26_s12, %s26_s12 }
   0xe   :  { %p389_p5 = scmp.ne.s32.totalorder %s26_s12, %s388_s16  ;;  %p394_p7 = scmp.lt.s32.totalorder %s388_s16, %s388_s16 }
  0x10   :  { %p395_p8 = por %p394_p7, %p393_p6 }
  0x12   :  { %p396_p9 = pnand %p395_p8, %p389_p5 }
  0x14   :  { %399 = shalt.err (!%p396_p9)
}
  0x15   :  { %s428_s17 = smov 64   ;;  %s429_s18 = smov 4  }
  0x16   :  { %31 = dma.hbm_to_vmem [thread:$0]  %s488_s1, 1024, %s26_s12, [#allocation6], %s428_s17, %s428_s17, %s429_s18  }
  0x17   :  { %420 = dma.done.wait [#allocation3], 32  }
  0x18   :  { %421 = vsyncadd [#allocation3], 4294967264 }
  0x19   :  { %422 = dma.done.wait [#allocation6], 1024  }
  0x1a   :  { %423 = vsyncadd [#allocation6], 4294966272  ;;  %v430_v0 = vmov 0.0   ;;  %vm431_vm0 = vmmov 0   ;;  %v352_v1 = vld [vmem:[#allocation5 + $0x38] sm:$0xff]   ;;  %v353_v2 = vld [vmem:[#allocation5 + $0x30] sm:$0xff]  }
  0x1b   :  { %285 = vmatprep.subr.bf16.mxu0 %v430_v0  ;;  %305 = vmatprep.subr.bf16.mxu1 %v430_v0  ;;  %v354_v3 = vld [vmem:[#allocation5 + $0x28] sm:$0xff]   ;;  %v355_v4 = vld [vmem:[#allocation5 + $0x20] sm:$0xff]   ;;  %v356_v5 = vld [vmem:[#allocation5 + $0x18] sm:$0xff]   ;;  %s432_s0 = smov [#allocation7]  }
  0x1c   :  { %301 = vmatprep.mubr.msk.bf16.mxu0 %vm431_vm0, %v430_v0  ;;  %321 = vmatprep.mubr.msk.bf16.mxu1 %vm431_vm0, %v430_v0  ;;  %v55_v6 = vld [vmem:[#allocation2] sm:$0x3]  ;;  %v357_v8 = vld [vmem:[#allocation5 + $0x10] sm:$0xff]   ;;  %v358_v10 = vld [vmem:[#allocation5 + $0x8] sm:$0xff]   ;;  %s240_s1 = sshll.u32 %s432_s0, 4  ;;  %s241_s1 = int_to_ptr.vmem [resolvable:$true] %s240_s1 }
  0x1d   :  { %286 = vmatpush3.bf16.msra.mxu0 %v352_v1  ;;  %306 = vmatpush3.bf16.msra.mxu1 %v352_v1  ;;  %v56_v7 = vpack.c.bf16 %v55_v6, %v55_v6  ;;  %v359_v12 = vld [vmem:[#allocation5] sm:$0xff]   ;;  %s400_s21 = scalar_lea.vmem %s241_s1, 32  ;;  %p405_p11 = scmp.lt.s32.totalorder %s241_s1, %s241_s1 }
  0x1e   :  { %287 = vmatprep.subr.bf16.mxu0 %v430_v0  ;;  %307 = vmatprep.subr.bf16.mxu1 %v430_v0  ;;  %p401_p10 = scmp.ne.s32.totalorder %s241_s1, %s400_s21  ;;  %p406_p12 = scmp.lt.s32.totalorder %s400_s21, %s400_s21 }
  0x1f   :  { %v57_v9 = vunpack.c.l.bf16 %v56_v7 }
  0x20   :  { %p407_p13 = por %p406_p12, %p405_p11 }
  0x21   :  { %288 = vmatpush3.bf16.msra.mxu0 %v353_v2  ;;  %308 = vmatpush3.bf16.msra.mxu1 %v353_v2  ;;  %v58_v11 = vsub.f32 %v55_v6, %v57_v9 }
  0x22   :  { %289 = vmatprep.subr.bf16.mxu0 %v430_v0  ;;  %309 = vmatprep.subr.bf16.mxu1 %v430_v0  ;;  %p408_p0 = pnand %p407_p13, %p401_p10 }
  0x23   :  { %v59_v13 = vpack.c.bf16 %v58_v11, %v58_v11 }
  0x25   :  { %290 = vmatpush3.bf16.msra.mxu0 %v354_v3  ;;  %310 = vmatpush3.bf16.msra.mxu1 %v354_v3  ;;  %v60_v14 = vunpack.c.l.bf16 %v59_v13 }
  0x26   :  { %291 = vmatprep.subr.bf16.mxu0 %v430_v0  ;;  %311 = vmatprep.subr.bf16.mxu1 %v430_v0 }
  0x27   :  { %v61_v15 = vsub.f32 %v58_v11, %v60_v14 }
  0x29   :  { %292 = vmatpush3.bf16.msra.mxu0 %v355_v4  ;;  %312 = vmatpush3.bf16.msra.mxu1 %v355_v4  ;;  %v62_v16 = vpack.c.bf16 %v61_v15, %v61_v15 }
  0x2a   :  { %293 = vmatprep.subr.bf16.mxu0 %v430_v0  ;;  %313 = vmatprep.subr.bf16.mxu1 %v430_v0 }
  0x2d   :  { %294 = vmatpush3.bf16.msra.mxu0 %v356_v5  ;;  %314 = vmatpush3.bf16.msra.mxu1 %v356_v5 }
  0x2e   :  { %295 = vmatprep.subr.bf16.mxu0 %v430_v0  ;;  %315 = vmatprep.subr.bf16.mxu1 %v430_v0 }
  0x31   :  { %296 = vmatpush3.bf16.msra.mxu0 %v357_v8  ;;  %316 = vmatpush3.bf16.msra.mxu1 %v357_v8 }
  0x32   :  { %297 = vmatprep.subr.bf16.mxu0 %v430_v0  ;;  %317 = vmatprep.subr.bf16.mxu1 %v430_v0 }
  0x35   :  { %298 = vmatpush3.bf16.msra.mxu0 %v358_v10  ;;  %318 = vmatpush3.bf16.msra.mxu1 %v358_v10 }
  0x36   :  { %299 = vmatprep.subr.bf16.mxu0 %v430_v0  ;;  %319 = vmatprep.subr.bf16.mxu1 %v430_v0 }
  0x39   :  { %300 = vmatpush3.bf16.msra.mxu0 %v359_v12  ;;  %320 = vmatpush3.bf16.msra.mxu1 %v359_v12 }
  0x3a   :  { %325 = vmatprep.subr.bf16.mxu0 %v430_v0 }
  0x3c   :  { %302 = vmatmul.mubr.bf16.vlgmr.msra.gmra.mxu0 %v59_v13  ;;  %322 = vmatmul.mubr.bf16.vlgmr.msra.gmra.mxu1 %v56_v7 }
  0x3d   :  { %326 = vmatpush3.bf16.msra.mxu0 %v352_v1  ;;  %341 = vmatprep.mubr.msk.bf16.mxu0 %vm431_vm0, %v430_v0 }
  0x3e   :  { %327 = vmatprep.subr.bf16.mxu0 %v430_v0 }
  0x41   :  { %328 = vmatpush3.bf16.msra.mxu0 %v353_v2 }
  0x42   :  { %329 = vmatprep.subr.bf16.mxu0 %v430_v0 }
  0x45   :  { %330 = vmatpush3.bf16.msra.mxu0 %v354_v3 }
  0x46   :  { %331 = vmatprep.subr.bf16.mxu0 %v430_v0 }
  0x49   :  { %332 = vmatpush3.bf16.msra.mxu0 %v355_v4 }
  0x4a   :  { %333 = vmatprep.subr.bf16.mxu0 %v430_v0 }
  0x4d   :  { %334 = vmatpush3.bf16.msra.mxu0 %v356_v5 }
  0x4e   :  { %335 = vmatprep.subr.bf16.mxu0 %v430_v0 }
  0x51   :  { %336 = vmatpush3.bf16.msra.mxu0 %v357_v8 }
  0x52   :  { %337 = vmatprep.subr.bf16.mxu0 %v430_v0 }
  0x55   :  { %338 = vmatpush3.bf16.msra.mxu0 %v358_v10 }
  0x56   :  { %339 = vmatprep.subr.bf16.mxu0 %v430_v0 }
  0x59   :  { %340 = vmatpush3.bf16.msra.mxu0 %v359_v12 }
  0x5c   :  { %342 = vmatmul.mubr.bf16.vlgmr.msra.gmra.mxu0 %v62_v16 }
  0xfc   :  { %v145_v17 = vpop.f32.mrf.mxu0  ;;  %v185_v18 = vpop.f32.mrf.mxu1 }
  0xfd   :  { %v186_v25 = vadd.f32 %v185_v18, %v145_v17 }
  0xfe   :  { %v303_v19 = vpop.f32.mrf.mxu0  ;;  %v323_v20 = vpop.f32.mrf.mxu1 }
 0x100   :  { %v148_v21 = vpop.f32.mrf.mxu0  ;;  %v188_v22 = vpop.f32.mrf.mxu1 }
 0x102   :  { %v304_v23 = vpop.f32.mrf.mxu0  ;;  %v324_v24 = vpop.f32.mrf.mxu1 }
 0x11c   :  { %v225_v26 = vpop.f32.mrf.mxu0 }
 0x11d   :  { %v231_v27 = vadd.f32 %v225_v26, %v186_v25 }
 0x11e   :  { %v343_v28 = vpop.f32.mrf.mxu0 }
 0x11f   :  { %v232_v29 = vmul.f32 0.2, %v231_v27 }
 0x120   :  { %v228_v30 = vpop.f32.mrf.mxu0 }
 0x121   :  { %233 = vst [vmem:[#allocation7] sm:$0x3] %v232_v29 }
 0x122   :  { %v344_v31 = vpop.f32.mrf.mxu0 }
 0x123   :  { %411 = shalt.err (!%p408_p0)
}
 0x124   :  { %243 = dma.vmem_to_hbm [thread:$0]  %s241_s1, 32, %s489_s2, [#allocation4]  }
 0x125   :  { %424 = dma.done.wait [#allocation4], 32  }
 0x126   :  { %425 = vsyncadd [#allocation4], 4294967264 }
 0x127   :  { %247 = vsyncpa [#allocation3], 1 }
 0x128   :  { %248 = vsyncpa [#allocation6], 1 }
 0x129   :  { %249 = vsyncpa [#allocation4], 1 }

</bundles_post_ra>
